<compile_context>
chip_gen: v6e
topology: v6e:2x2x1
jax: 0.10.0
libtpu: 0.0.40
codegen_flags: <defaults>
</compile_context>

<pallas_src>
import functools
import math

import jax
import jax.numpy as jnp
from jax.experimental import pallas as pl
from jax.experimental.pallas import tpu as pltpu


def _emb_kernel_split(time_ref, freqs_ref, out_ref, *, half_dim: int):
    # dim % 256 == 0: both half-stores start on a 128-lane boundary -> clean vst.
    t = time_ref[...]                              # (tb, 1) f32
    emb = t * freqs_ref[...]                       # (tb, half_dim), VPU broadcast
    out_ref[:, :half_dim] = jnp.sin(emb).astype(out_ref.dtype)
    out_ref[:, half_dim:] = jnp.cos(emb).astype(out_ref.dtype)


def _emb_kernel_fused(time_ref, freqs2_ref, out_ref, *, half_dim: int):
    # General dim: a store starting at lane `half_dim` would be masked/mid-vreg.
    # Compute the full-width embedding against duplicated freqs and issue ONE
    # lane-dense store, selecting sin vs cos per lane (extra EUP work is cheap;
    # the store slot / HBM writeback is the binding resource here).
    t = time_ref[...]                              # (tb, 1) f32
    emb = t * freqs2_ref[...]                      # (tb, dim)
    lane = jax.lax.broadcasted_iota(jnp.int32, emb.shape, 1)
    out = jnp.where(lane < half_dim, jnp.sin(emb), jnp.cos(emb))
    out_ref[...] = out.astype(out_ref.dtype)


def _round_up8(x: int) -> int:
    return ((x + 7) // 8) * 8


def _choose_tile_rows(b: int, dim: int) -> int:
    """Pick the batch-tile height (multiple of 8) for the pipeline."""
    if b <= 8:
        # Single full-extent block (block dims equal to array dims are allowed).
        return b
    # Per buffer: output block = tb*dim*4 B; the (tb, 1) time column is lane-
    # padded to 128 lanes in VMEM = tb*512 B. Double-buffered -> x2 each.
    # Keep the total comfortably under v5e's 16 MiB / v7x's 32 MiB scoped VMEM.
    bytes_per_row = dim * 4 + 512
    tb = (8 * 1024 * 1024) // (2 * bytes_per_row)      # ~8 MiB pipeline budget
    tb = min(tb, (4 * 1024 * 1024) // (4 * dim))       # output block <= ~4 MiB
    tb = min(tb, _round_up8(pl.cdiv(b, 2)))            # >= 2 grid steps (v7x, 2 TCs)
    tb = min(tb, _round_up8(b))                        # don't wildly exceed B
    return max(8, (tb // 8) * 8)


def sinusoidal_position_embeddings(
    time: jax.Array,
    dim: int,
    *,
    block_rows: int | None = None,
    out_dtype=jnp.float32,
) -> jax.Array:
    """Pallas TPU implementation of SinusoidalPositionEmbeddings.forward."""
    assert time.ndim == 1, "time must be a 1-D vector of timesteps"
    assert dim % 2 == 0 and dim > 2, "dim must be even and > 2"
    half_dim = dim // 2
    b = time.shape[0]

    # Hoisted constant (no iota / exp in the kernel body).
    log_scale = math.log(10000.0) / (half_dim - 1)
    freqs = jnp.exp(
        jnp.arange(half_dim, dtype=jnp.float32) * jnp.float32(-log_scale)
    )

    if block_rows is None:
        tb = _choose_tile_rows(b, dim)
    else:
        # Robustness: round user tile down to a multiple of 8 (8,128 rule).
        tb = max(8, (block_rows // 8) * 8)
        tb = min(tb, _round_up8(b)) if b >= 8 else b

    # Store-path selection (lane alignment of the cos half).
    lane_aligned = (half_dim % 128 == 0)
    if lane_aligned:
        kernel = functools.partial(_emb_kernel_split, half_dim=half_dim)
        freqs_op = freqs.reshape(1, half_dim)
        freqs_spec = pl.BlockSpec((1, half_dim), lambda i: (0, 0))
    else:
        kernel = functools.partial(_emb_kernel_fused, half_dim=half_dim)
        freqs_op = jnp.concatenate([freqs, freqs]).reshape(1, dim)
        freqs_spec = pl.BlockSpec((1, dim), lambda i: (0, 0))

    time_2d = time.astype(jnp.float32).reshape(b, 1)

    # Ragged last block is handled by Pallas masking: no pad, no output slice.
    grid = (pl.cdiv(b, tb),)

    out = pl.pallas_call(
        kernel,
        out_shape=jax.ShapeDtypeStruct((b, dim), out_dtype),
        grid_spec=pltpu.PrefetchScalarGridSpec(
            num_scalar_prefetch=0,
            grid=grid,
            in_specs=[
                pl.BlockSpec((tb, 1), lambda i: (i, 0)),   # time column tile
                freqs_spec,                                 # tiny constant, resident
            ],
            out_specs=pl.BlockSpec((tb, dim), lambda i: (i, 0)),
        ),
        compiler_params=pltpu.CompilerParams(
            # Batch axis is embarrassingly parallel -> megacore sharding on v7x.
            dimension_semantics=("parallel",),
        ),
    )(time_2d, freqs_op)

    return out


def _reference(time: jax.Array, dim: int) -> jax.Array:
    # Pure-JAX reference matching the PyTorch module exactly.
    half_dim = dim // 2
    emb_scale = math.log(10000.0) / (half_dim - 1)
    freqs = jnp.exp(jnp.arange(half_dim, dtype=jnp.float32) * -emb_scale)
    emb = time.astype(jnp.float32)[:, None] * freqs[None, :]
    return jnp.concatenate((jnp.sin(emb), jnp.cos(emb)), axis=-1)


if __name__ == "__main__":
    key = jax.random.PRNGKey(0)
    k1, k2 = jax.random.split(key)

    # Case 1: small dim (dim % 256 != 0 -> fused lane-dense store path) with a
    # batch that is NOT a multiple of the tile (exercises the ragged last block).
    b1, d1 = 20, 32
    t1 = jax.random.uniform(k1, (b1,), dtype=jnp.float32, minval=0.0, maxval=1000.0)
    o1 = jax.block_until_ready(sinusoidal_position_embeddings(t1, d1))
    r1 = _reference(t1, d1)
    assert o1.shape == (b1, d1)
    assert jnp.allclose(o1, r1, atol=1e-5, rtol=1e-5), "mismatch vs reference (case 1)"

    # Case 2: dim % 256 == 0 -> lane-aligned split-store path, multi-step grid.
    b2, d2 = 16, 256
    t2 = jax.random.uniform(k2, (b2,), dtype=jnp.float32, minval=0.0, maxval=1000.0)
    o2 = jax.block_until_ready(sinusoidal_position_embeddings(t2, d2))
    r2 = _reference(t2, d2)
    assert o2.shape == (b2, d2)
    assert jnp.allclose(o2, r2, atol=1e-5, rtol=1e-5), "mismatch vs reference (case 2)"

    print("KERNEL_OK")
</pallas_src>

<mosaic_0001>
module attributes {stable_mosaic.version = 11 : i64} {
  func.func @_emb_kernel_fused(%arg0: i32, %arg1: memref<16x1xf32, #tpu.memory_space<vmem>>, %arg2: memref<1x32xf32, #tpu.memory_space<vmem>>, %arg3: memref<16x32xf32, #tpu.memory_space<vmem>>) attributes {dimension_semantics = [#tpu.dimension_semantics<parallel>], iteration_bounds = array<i64: 2>, scalar_prefetch = 0 : i64, scratch_operands = 0 : i64, tpu.core_type = #tpu.core_type<tc>, window_params = [{transform_indices = @transform_0, window_bounds = array<i64: 16, 1>}, {pipeline_mode = #tpu.pipeline_mode<synchronous>, transform_indices = @transform_1, window_bounds = array<i64: 1, 32>}, {transform_indices = @transform_2, window_bounds = array<i64: 16, 32>}]} {
    %c0 = arith.constant 0 : index
    %c0_0 = arith.constant 0 : index
    %0 = vector.load %arg1[%c0, %c0_0] : memref<16x1xf32, #tpu.memory_space<vmem>>, vector<16x1xf32>
    %c0_1 = arith.constant 0 : index
    %c0_2 = arith.constant 0 : index
    %1 = vector.load %arg2[%c0_1, %c0_2] : memref<1x32xf32, #tpu.memory_space<vmem>>, vector<1x32xf32>
    %2 = vector.broadcast %0 : vector<16x1xf32> to vector<16x32xf32>
    %3 = vector.broadcast %1 : vector<1x32xf32> to vector<16x32xf32>
    %4 = arith.mulf %2, %3 : vector<16x32xf32>
    %5 = tpu.iota {dimensions = array<i32: 1>} : vector<16x32xi32>
    %c16_i32 = arith.constant 16 : i32
    %6 = vector.broadcast %c16_i32 : i32 to vector<16x32xi32>
    %7 = arith.cmpi slt, %5, %6 : vector<16x32xi32>
    %8 = math.sin %4 : vector<16x32xf32>
    %9 = math.cos %4 : vector<16x32xf32>
    %10 = arith.select %7, %8, %9 : vector<16x32xi1>, vector<16x32xf32>
    %c0_3 = arith.constant 0 : index
    %c0_4 = arith.constant 0 : index
    %11 = vector.load %arg3[%c0_3, %c0_4] : memref<16x32xf32, #tpu.memory_space<vmem>>, vector<16x32xf32>
    tpu.vector_store %arg3[%c0_3, %c0_4], %10 {strides = array<i32>} : memref<16x32xf32, #tpu.memory_space<vmem>>, vector<16x32xf32>,
    return
  }
  func.func @transform_0(%arg0: i32) -> (i32, i32) {
    %c0_i32 = arith.constant 0 : i32
    %c0_i32_0 = arith.constant 0 : i32
    return %arg0, %c0_i32 : i32, i32
  }
  func.func @transform_1(%arg0: i32) -> (i32, i32) {
    %c0_i32 = arith.constant 0 : i32
    %c0_i32_0 = arith.constant 0 : i32
    %c0_i32_1 = arith.constant 0 : i32
    return %c0_i32, %c0_i32_0 : i32, i32
  }
  func.func @transform_2(%arg0: i32) -> (i32, i32) {
    %c0_i32 = arith.constant 0 : i32
    %c0_i32_0 = arith.constant 0 : i32
    return %arg0, %c0_i32 : i32, i32
  }
}

</mosaic_0001>

<bundles_post_ra>
// kernel: tpu_custom_call.1
= control target key start
LH: loop header
LB: loop body
LE: loop exit
PB: predicated region body
PF: predicated region fallthrough
CT: control target
= control target key end

     0   :  { %7 = vsyncpa [#allocation3], 0  ;;  %s1079_s0 = inlined_call_operand.vmem [shape: f32[20,1], index: 0, kind: input, shape index: {}]   ;;  %s1080_s1 = inlined_call_operand.vmem [shape: f32[1,32], index: 1, kind: input, shape index: {}]   ;;  %s1081_s2 = inlined_call_operand.hbm [shape: f32[20,32], index: 2, kind: output, shape index: {}]  }
   0x1   :  { %9 = vsyncpa [#allocation3 + $0x1], 0  ;;  %s879_s9 = smov 0   ;;  %s881_s10 = smov 0  }
   0x2   :  { %s883_s11 = smov 0   ;;  %s885_s12 = smov 0  }
   0x3 LB: > { %s900_s13 = sadd.s32 4294967295, %s852_s12   ;;  %s694_s14 = sadd.s32 4294967294, %s852_s12   ;;  %s852_s12 = sphi %s885_s12, %s1089_s12   ;;  %s848_s11 = sphi %s883_s11, %s1088_s11   ;;  %s844_s10 = sphi %s881_s10, %s1087_s10   ;;  %s840_s9 = sphi %s879_s9, %s1086_s9  }
   0x4   : > { %s904_s15 = sadd.s32 1, %s852_s12   ;;  %s69_s16 = sadd.s32 1, %s848_s11 }
   0x5   : > { %s66_s17 = ssub.s32 %s852_s12, %s904_s15  ;;  %p79_p0 = scmp.ne.s32.totalorder %s848_s11, %s844_s10 }
   0x6   : > { %p67_p1 = scmp.eq.s32.totalorder %s66_s17, 0  ;;  %p80_p2 = scmp.eq.s32.totalorder %s900_s13, 1 }
   0x7   : > { %p85_p3 = scmp.ne.s32.totalorder %s844_s10, %s840_s9  ;;  %p86_p4 = scmp.eq.s32.totalorder %s694_s14, 1 }
   0x8   : > { %s915_s18 = scalar_select %p67_p1, %s848_s11, %s69_s16  }
   0x9   : > { %p917_p5 = por %p80_p2, %p79_p0  ;;  %p921_p6 = por %p86_p4, %p85_p3 }
   0xa   : > { %p697_p7 = scmp.ge.s32.totalorder %s852_s12, 1  ;;  %p124_p8 = scmp.lt.s32.totalorder %s852_s12, 3 }
   0xc   : > { %p125_p9 = pnand %p697_p7, %p124_p8 }
   0xd   : > { %s928_s21 = sshll.u32 (!%p125_p9), %s900_s13, 1  ;;  %s147_s27 = sand.u32 (!%p125_p9), 1, %s844_s10  }
   0xe   : > { %128 = sbr.rel (%p125_p9) target bundleno = 272 (0x110), region = 28  ;;  %p155_p10 = scmp.lt.s32.totalorder (!%p125_p9), %s928_s21, 2 }
   0xf   : > { %s698_s30 = sshll.u32 (!%p125_p9), %s147_s27, 4  ;;  %s1019_s4 = scalar_lea.sflag (!%p125_p9), [#allocation3], %s147_s27 }
  0x10   : > { %s1009_s3 = scalar_lea.vmem (!%p125_p9), [#allocation2], %s698_s30 }
  0x13   : > { %v854_v0 = vmov 0   ;;  %s156_s22 = scalar_select %p155_p10, %s928_s21, 2  ;;  %v701_v3 = vld [vmem:[%s1080_s1] ss:$0 sm:$0xff]  ;;  %v855_v24 = vmov 683565275  }
  0x14   : > { %783 = vset.pattern.permute.xlu0 %v854_v0  ;;  %v856_v28 = vmov 2475754826   ;;  %v857_v30 = vmov 2131351028   ;;  %v858_v32 = vmov 2102212464  }
  0x15   : > { %s700_s23 = sshll.u32 %s156_s22, 3  ;;  %v859_v34 = vmov 920167782   ;;  %v860_v41 = vmov 1326507024   ;;  %s621_s5 = ssub.s32 (%p917_p5), 3, %s928_s21 }
  0x16   : > { %s158_s26 = scalar_lea.vmem %s1079_s0, %s700_s23  ;;  %p622_p11 = scmp.lt.s32.totalorder (%p917_p5), %s621_s5, 2 }
  0x17   : > { %v169_v1 = vld [vmem:[%s158_s26] sm:$0xff]  ;;  %v170_v2 = vld [vmem:[%s158_s26 + $0x8] sm:$0xff] }
  0x18   : > { %174 = vperm.xlu0 %783, %v169_v1  }
  0x1c   : > { %179 = vperm.xlu0 %783, %v170_v2  }
  0x93   : > { %v175_v4 = vpop.permute.xlu0 %174 }
  0x94   : > { %v939_v5 = vmul.f32 %v701_v3, %v175_v4 }
  0x96   : > { %v193_v6 = vand.u32 2147483647, %v939_v5  ;;  %v196_v7 = vand.u32 2139095040, %v939_v5  ;;  %vm195_vm14 = vcmp.lt.s32.totalorder %v939_v5, 0 }
  0x97   : > { %v180_v8 = vpop.permute.xlu0 %179 }
  0x98   : > { %v197_v9 = vshrl.u32 %v196_v7, 23  ;;  %v943_v10 = vmul.f32 %v701_v3, %v180_v8  ;;  %v200_v11 = vand.u32 8388607, %v193_v6  ;;  %vm194_vm15 = vcmp.le.f32.partialorder %v193_v6, 0.7853982 }
  0x9a   : > { %v702_v12 = vadd.s32 4294967169, %v197_v9  ;;  %v300_v13 = vand.u32 2139095040, %v943_v10  ;;  %v201_v15 = vor.u32 8388608, %v200_v11  ;;  %v297_v17 = vand.u32 2147483647, %v943_v10 }
  0x9c   : > { %v203_v14 = vadd.s32 1, %v702_v12  ;;  %v301_v16 = vshrl.u32 %v300_v13, 23  ;;  %v949_v22 = vshll.u32 %v201_v15, 8  ;;  %v304_v26 = vand.u32 8388607, %v297_v17 }
  0x9e   : > { %vm204_vm0 = vcmp.gt.s32.totalorder %v203_v14, 0  ;;  %v706_v19 = vadd.s32 4294967169, %v301_v16  ;;  %v305_v56 = vor.u32 8388608, %v304_v26 }
  0x9f   : > { %v205_v18 = vsel %vm204_vm0, %v203_v14, 0  ;;  %vm299_vm0 = vcmp.lt.s32.totalorder %v943_v10, 0 }
  0xa0   : > { %v206_v20 = vshrl.u32 %v205_v18, 5  ;;  %v207_v21 = vand.u32 31, %v205_v18  ;;  %v307_v27 = vadd.s32 1, %v706_v19  ;;  %v345_v7 = vshll.u32 %v305_v56, 8 }
  0xa2   : > { %v208_v23 = vsub.s32 32, %v207_v21  ;;  %v210_v25 = vshll.u32 %v855_v24, %v207_v21  ;;  %v213_v29 = vshll.u32 %v856_v28, %v207_v21  ;;  %v216_v31 = vshll.u32 %v857_v30, %v207_v21 }
  0xa3   : > { %v219_v33 = vshll.u32 %v858_v32, %v207_v21  ;;  %v222_v35 = vshll.u32 %v859_v34, %v207_v21  ;;  %vm225_vm1 = vcmp.lt.s32.totalorder %v206_v20, 1  ;;  %vm227_vm2 = vcmp.lt.s32.totalorder %v206_v20, 3 }
  0xa4   : > { %v211_v36 = vshrl.u32 %v856_v28, %v208_v23  ;;  %v214_v37 = vshrl.u32 %v857_v30, %v208_v23  ;;  %v217_v38 = vshrl.u32 %v858_v32, %v208_v23  ;;  %v209_v39 = vshrl.u32 %v855_v24, %v208_v23 }
  0xa5   : > { %v220_v40 = vshrl.u32 %v859_v34, %v208_v23  ;;  %v223_v42 = vshrl.u32 %v860_v41, %v208_v23  ;;  %vm308_vm3 = vcmp.gt.s32.totalorder %v307_v27, 0  ;;  %vm228_vm4 = vcmp.lt.s32.totalorder %v206_v20, 4 }
  0xa6   : > { %v212_v43 = vor.u32 %v211_v36, %v210_v25  ;;  %v215_v44 = vor.u32 %v214_v37, %v213_v29  ;;  %v218_v45 = vor.u32 %v217_v38, %v216_v31  ;;  %v309_v48 = vsel %vm308_vm3, %v307_v27, 0 }
  0xa7   : > { %v221_v46 = vor.u32 %v220_v40, %v219_v33  ;;  %v224_v47 = vor.u32 %v223_v42, %v222_v35  ;;  %vm226_vm5 = vcmp.lt.s32.totalorder %v206_v20, 2  ;;  %v311_v59 = vand.u32 31, %v309_v48 }
  0xa8   : > { %v229_v49 = vsel %vm225_vm1, %v209_v39, %v212_v43  ;;  %v230_v50 = vsel %vm228_vm4, %v218_v45, 2102212464  ;;  %v233_v51 = vsel %vm225_vm1, %v212_v43, %v215_v44  ;;  %v237_v52 = vsel %vm225_vm1, %v215_v44, %v218_v45 }
  0xa9   : > { %v231_v53 = vsel %vm227_vm2, %v215_v44, %v230_v50  ;;  %v234_v54 = vsel %vm228_vm4, %v221_v46, 920167782  ;;  %v238_v55 = vsel %vm228_vm4, %v224_v47, 1326507024  ;;  %v310_v3 = vshrl.u32 %v309_v48, 5 }
  0xaa   : > { %v235_v57 = vsel %vm227_vm2, %v218_v45, %v234_v54  ;;  %v239_v58 = vsel %vm227_vm2, %v221_v46, %v238_v55  ;;  %v232_v60 = vsel %vm226_vm5, %v229_v49, %v231_v53  ;;  %v312_v4 = vsub.s32 32, %v311_v59 }
  0xab   : > { %v236_v61 = vsel %vm226_vm5, %v233_v51, %v235_v57  ;;  %v240_v62 = vsel %vm226_vm5, %v237_v52, %v239_v58  ;;  %v248_v8 = vmul.u32 %v949_v22, %v232_v60  ;;  %v314_v9 = vshll.u32 %v855_v24, %v311_v59 }
  0xac   : > { %v962_v63 = vmul.u32.u64.low %v949_v22, %v240_v62  ;;  %v963_v0 = vmul.u32.u64.high %v949_v22, %v240_v62, %v962_v63  ;;  %v966_v1 = vmul.u32.u64.low %v949_v22, %v236_v61  ;;  %v967_v2 = vmul.u32.u64.high %v949_v22, %v236_v61, %v966_v1 }
  0xad   : > { %v317_v11 = vshll.u32 %v856_v28, %v311_v59  ;;  %v320_v12 = vshll.u32 %v857_v30, %v311_v59  ;;  %v315_v13 = vshrl.u32 %v856_v28, %v312_v4  ;;  %v318_v14 = vshrl.u32 %v857_v30, %v312_v4 }
  0xae   : > { %v321_v15 = vshrl.u32 %v858_v32, %v312_v4  ;;  %v323_v16 = vshll.u32 %v858_v32, %v311_v59  ;;  %vm250_vm6 = vc.u32 %v963_v0, %v966_v1  ;;  %v251_v18 = vadd.s32 1, %v967_v2 }
  0xaf   : > { %v324_v19 = vshrl.u32 %v859_v34, %v312_v4  ;;  %v326_v20 = vshll.u32 %v859_v34, %v311_v59  ;;  %v316_v21 = vor.u32 %v315_v13, %v314_v9  ;;  %v319_v23 = vor.u32 %v318_v14, %v317_v11 }
  0xb0   : > { %v322_v25 = vor.u32 %v321_v15, %v320_v12  ;;  %v327_v26 = vshrl.u32 %v860_v41, %v312_v4  ;;  %v252_v22 = vsel %vm250_vm6, %v251_v18, %v967_v2  ;;  %vm329_vm7 = vcmp.lt.s32.totalorder %v310_v3, 1 }
  0xb1   : > { %v325_v27 = vor.u32 %v324_v19, %v323_v16  ;;  %vm332_vm8 = vcmp.lt.s32.totalorder %v310_v3, 4  ;;  %v253_v28 = vadd.s32 %v252_v22, %v248_v8  ;;  %vm331_vm9 = vcmp.lt.s32.totalorder %v310_v3, 3 }
  0xb2   : > { %v328_v29 = vor.u32 %v327_v26, %v326_v20  ;;  %v334_v30 = vsel %vm332_vm8, %v322_v25, 2102212464  ;;  %v313_v31 = vshrl.u32 %v855_v24, %v312_v4  ;;  %v337_v32 = vsel %vm329_vm7, %v316_v21, %v319_v23 }
  0xb3   : > { %v338_v33 = vsel %vm332_vm8, %v325_v27, 920167782  ;;  %v341_v35 = vsel %vm329_vm7, %v319_v23, %v322_v25  ;;  %v254_v36 = vadd.s32 536870912, %v253_v28  ;;  %vm330_vm10 = vcmp.lt.s32.totalorder %v310_v3, 2 }
  0xb4   : > { %v339_v34 = vsel %vm331_vm9, %v322_v25, %v338_v33  ;;  %v342_v37 = vsel %vm332_vm8, %v328_v29, 1326507024  ;;  %v333_v38 = vsel %vm329_vm7, %v313_v31, %v316_v21  ;;  %v335_v39 = vsel %vm331_vm9, %v319_v23, %v334_v30 }
  0xb5   : > { %v340_v40 = vsel %vm330_vm10, %v337_v32, %v339_v34  ;;  %v343_v41 = vsel %vm331_vm9, %v325_v27, %v342_v37  ;;  %v255_v42 = vshrl.u32 %v254_v36, 30  ;;  %v336_v48 = vsel %vm330_vm10, %v333_v38, %v335_v39 }
  0xb6   : > { %v344_v43 = vsel %vm330_vm10, %v341_v35, %v343_v41  ;;  %v977_v44 = vmul.u32.u64.low %v345_v7, %v340_v40  ;;  %v978_v45 = vmul.u32.u64.high %v345_v7, %v340_v40, %v977_v44  ;;  %v352_v51 = vmul.u32 %v345_v7, %v336_v48 }
  0xb7   : > { %v980_v46 = vmul.u32.u64.low %v345_v7, %v344_v43  ;;  %v981_v47 = vmul.u32.u64.high %v345_v7, %v344_v43, %v980_v46  ;;  %v256_v24 = vshll.u32 %v255_v42, 30  ;;  %v249_v63 = vadd.s32 %v966_v1, %v963_v0 }
  0xb8   : > { %v355_v50 = vadd.s32 1, %v978_v45  ;;  %v279_v26 = vsub.s32 4, %v255_v42  ;;  %v190_v39 = vlaneseq  ;;  %vm996_vm1 = vcmp.le.f32.partialorder %v297_v17, 0.7853982 }
  0xb9   : > { %v257_v49 = vsub.s32 %v253_v28, %v256_v24  ;;  %vm354_vm11 = vc.u32 %v981_v47, %v977_v44  ;;  %v353_v23 = vadd.s32 %v977_v44, %v981_v47  ;;  %vm609_vm3 = vcmask 261120  }
  0xba   : > { %v356_v53 = vsel %vm354_vm11, %v355_v50, %v978_v45  ;;  %v280_v33 = vsel %vm195_vm14, %v279_v26, %v255_v42  ;;  %v191_v44 = vand.u32 127, %v190_v39  ;;  %vm285_vm10 = vweird.f32 %v939_v5 }
  0xbb   : > { %v259_v52 = vsub.s32 0, %v257_v49  ;;  %v357_v54 = vadd.s32 %v356_v53, %v352_v51  ;;  %v282_v37 = vsel %vm194_vm15, 0, %v280_v33 }
  0xbc   : > { %v286_v40 = vadd.s32 3, %v282_v37  ;;  %v494_v47 = vand.u32 3, %v282_v37  ;;  %vm192_vm2 = vcmp.lt.s32.totalorder %v191_v44, 16 }
  0xbd   : > { %v703_v55 = vmin.u32 %v259_v52, %v257_v49  ;;  %v358_v56 = vadd.s32 536870912, %v357_v54 }
  0xbe   : > { %v287_v46 = vand.u32 3, %v286_v40  ;;  %vm499_vm5 = vcmp.eq.s32.totalorder %v494_v47, 2  ;;  %vm496_vm7 = vcmp.eq.s32.totalorder %v494_v47, 0  ;;  %vm495_vm9 = vcmp.lt.s32.totalorder %v494_v47, 2 }
  0xbf   : > { %v261_v57 = vclz %v703_v55  ;;  %v359_v58 = vshrl.u32 %v358_v56, 30 }
  0xc0   : > { %vm292_vm4 = vcmp.eq.s32.totalorder %v287_v46, 2  ;;  %vm289_vm6 = vcmp.eq.s32.totalorder %v287_v46, 0  ;;  %vm288_vm8 = vcmp.lt.s32.totalorder %v287_v46, 2 }
  0xc1   : > { %v704_v59 = vadd.s32 4294967294, %v261_v57  ;;  %v360_v60 = vshll.u32 %v359_v58, 30  ;;  %v383_v6 = vsub.s32 4, %v359_v58 }
  0xc3   : > { %vm705_vm12 = vcmp.lt.s32.totalorder %v704_v59, 0  ;;  %v361_v62 = vsub.s32 %v357_v54, %v360_v60  ;;  %v384_v24 = vsel %vm299_vm0, %v383_v6, %v359_v58 }
  0xc4   : > { %v264_v61 = vsel %vm705_vm12, 0, %v704_v59  ;;  %v386_v51 = vsel %vm996_vm1, 0, %v384_v24 }
  0xc5   : > { %v265_v2 = vsub.s32 32, %v264_v61  ;;  %v269_v3 = vsub.s32 4294967266, %v264_v61  ;;  %v363_v4 = vsub.s32 0, %v361_v62  ;;  %v266_v7 = vshll.u32 %v257_v49, %v264_v61 }
  0xc6   : > { %v390_v58 = vadd.s32 3, %v386_v51 }
  0xc7   : > { %v267_v8 = vshrl.u32 %v249_v63, %v265_v2  ;;  %v270_v9 = vadd.s32 127, %v269_v3  ;;  %v707_v11 = vmin.u32 %v363_v4, %v361_v62  ;;  %v597_v63 = vand.u32 3, %v386_v51 }
  0xc9   : > { %v268_v12 = vor.u32 %v267_v8, %v266_v7  ;;  %v271_v13 = vshll.u32 %v270_v9, 23  ;;  %v365_v14 = vclz %v707_v11  ;;  %vm602_vm12 = vcmp.eq.s32.totalorder %v597_v63, 2 }
  0xcb   : > { %v272_v15 = vor.u32 4788187, %v271_v13  ;;  %v708_v16 = vadd.s32 4294967294, %v365_v14  ;;  %v275_v19 = vcvt.s32.f32 %v268_v12 }
  0xcd   : > { %v273_v18 = vand.u32 2147483647, %v272_v15  ;;  %vm709_vm13 = vcmp.lt.s32.totalorder %v708_v16, 0 }
  0xce   : > { %v368_v21 = vsel %vm709_vm13, 0, %v708_v16 }
  0xcf   : > { %v276_v20 = vmul.f32 %v275_v19, %v273_v18  ;;  %v369_v0 = vsub.s32 32, %v368_v21  ;;  %v373_v1 = vsub.s32 4294967266, %v368_v21  ;;  %v370_v22 = vshll.u32 %v361_v62, %v368_v21 }
  0xd0   : > { %v391_v62 = vand.u32 3, %v390_v58 }
  0xd1   : > { %v277_v25 = vxor.u32 2147483648, %v276_v20  ;;  %v371_v27 = vshrl.u32 %v353_v23, %v369_v0  ;;  %v374_v28 = vadd.s32 127, %v373_v1 }
  0xd2   : > { %vm396_vm11 = vcmp.eq.s32.totalorder %v391_v62, 2  ;;  %vm393_vm13 = vcmp.eq.s32.totalorder %v391_v62, 0 }
  0xd3   : > { %v278_v29 = vsel %vm195_vm14, %v277_v25, %v276_v20  ;;  %v372_v31 = vor.u32 %v371_v27, %v370_v22  ;;  %v375_v32 = vshll.u32 %v374_v28, 23  ;;  %vm599_vm14 = vcmp.eq.s32.totalorder %v597_v63, 0 }
  0xd4   : > { %v281_v30 = vsel %vm194_vm15, %v939_v5, %v278_v29  ;;  %vm392_vm15 = vcmp.lt.s32.totalorder %v391_v62, 2 }
  0xd5   : > { %784 = vcosq.f32 %v281_v30  ;;  %v376_v35 = vor.u32 4788187, %v375_v32  ;;  %v379_v34 = vcvt.s32.f32 %v372_v31 }
  0xd6   : > { %786 = vsinq.f32 %v281_v30 }
  0xd7   : > { %v377_v36 = vand.u32 2147483647, %v376_v35 }
  0xd9   : > { %v380_v38 = vmul.f32 %v379_v34, %v377_v36 }
  0xdb   : > { %v381_v41 = vxor.u32 2147483648, %v380_v38 }
  0xdd   : > { %v382_v42 = vsel %vm299_vm0, %v381_v41, %v380_v38  ;;  %vm598_vm0 = vcmp.lt.s32.totalorder %v597_v63, 2 }
  0xde   : > { %v385_v45 = vsel %vm996_vm1, %v943_v10, %v382_v42  ;;  %vm389_vm1 = vweird.f32 %v943_v10 }
  0xdf   : > { %788 = vcosq.f32 %v385_v45 }
  0xe0   : > { %790 = vsinq.f32 %v385_v45 }
  0xe2   : > { %v785_v48 = vpop.eup %784 }
  0xe3   : > { %v787_v49 = vpop.eup %786  ;;  %v293_v50 = vxor.u32 2147483648, %v785_v48 }
  0xe4   : > { %v290_v17 = vxor.u32 2147483648, %v787_v49 }
  0xe5   : > { %v294_v52 = vsel %vm292_vm4, %v293_v50, %v787_v49  ;;  %v501_v53 = vsel %vm499_vm5, %v293_v50, %v787_v49 }
  0xe6   : > { %v291_v54 = vsel %vm289_vm6, %v785_v48, %v290_v17  ;;  %v498_v55 = vsel %vm496_vm7, %v785_v48, %v290_v17 }
  0xe7   : > { %v295_v56 = vsel %vm288_vm8, %v291_v54, %v294_v52  ;;  %v502_v57 = vsel %vm495_vm9, %v498_v55, %v501_v53 }
  0xe8   : > { %v296_v59 = vsel %vm285_vm10, nan, %v295_v56  ;;  %v503_v60 = vsel %vm285_vm10, nan, %v502_v57 }
  0xe9   : > { %v607_v61 = vsel %vm192_vm2, %v296_v59, %v503_v60 }
  0xea   : > { %610 = vst.msk [vmem:[%s1009_s3] sm:$0xff] %vm609_vm3, %v607_v61 }
  0xec   : > { %v789_v2 = vpop.eup %788 }
  0xed   : > { %v791_v3 = vpop.eup %790  ;;  %v397_v4 = vxor.u32 2147483648, %v789_v2 }
  0xee   : > { %v394_v7 = vxor.u32 2147483648, %v791_v3 }
  0xef   : > { %v398_v5 = vsel %vm396_vm11, %v397_v4, %v791_v3  ;;  %v604_v8 = vsel %vm602_vm12, %v397_v4, %v791_v3 }
  0xf0   : > { %v395_v9 = vsel %vm393_vm13, %v789_v2, %v394_v7  ;;  %v601_v11 = vsel %vm599_vm14, %v789_v2, %v394_v7  ;;  %619 = sbr.rel (!%p917_p5) target bundleno = 272 (0x110), region = 32 }
  0xf1   : > { %v399_v12 = vsel %vm392_vm15, %v395_v9, %v398_v5  ;;  %v605_v13 = vsel %vm598_vm0, %v601_v11, %v604_v8 }
  0xf2   : > { %v400_v14 = vsel %vm389_vm1, nan, %v399_v12  ;;  %v606_v15 = vsel %vm389_vm1, nan, %v605_v13 }
  0xf3   : > { %v608_v16 = vsel %vm192_vm2, %v400_v14, %v606_v15 }
  0xf4   : > { %611 = vst.msk [vmem:[%s1009_s3 + $0x8] sm:$0xff] %vm609_vm3, %v608_v16 }
  0xf5   : > { %s1091_s5 = smov (!%p622_p11, %s621_s5), 2 }
  0xf6   : > { %s1024_s6 = sshll.u32 %s1091_s5, 7 }
  0xf7   : > { %s626_s7 = ssub.s32 256, %s1024_s6 }
  0xf8   : > { %627 = vsyncadd %s1019_s4, %s626_s7  ;;  %p721_p12 = scmp.ne.s32.totalorder %s1024_s6, 0  ;;  %s727_s8 = sshll.u32 %s900_s13, 8 }
  0xf9   : > { %s1033_s17 = scalar_lea.hbm %s1081_s2, %s727_s8  ;;  %s632_s19 = sshll.u32 %s1009_s3, 4  ;;  %s1036_s19 = int_to_ptr.vmem [resolvable:$true] %s632_s19 }
  0xfa   : > { %s792_s21 = scalar_lea.vmem %s1036_s19, %s1024_s6  ;;  %s861_s22 = smov [#allocation2]  }
  0xfb   : > { %p793_p13 = scmp.ne.s32.totalorder %s1036_s19, %s792_s21  ;;  %s796_s23 = sshll.u32 %s861_s22, 4  ;;  %s797_s23 = int_to_ptr.vmem [resolvable:$false] %s796_s23 }
  0xfc   : > { %s798_s13 = scalar_lea.vmem %s797_s23, 512  ;;  %p799_p2 = scmp.lt.s32.totalorder %s1036_s19, %s797_s23 }
  0xfd   : > { %p794_p0 = pnand %p793_p13, %p721_p12  ;;  %p800_p3 = scmp.lt.s32.totalorder %s798_s13, %s792_s21 }
  0xff   : > { %p795_p1 = pneg %p794_p0  ;;  %p801_p4 = por %p800_p3, %p799_p2 }
 0x101   : > { %p802_p5 = pnand %p801_p4, %p795_p1 }
 0x103   : > { %805 = shalt.err (!%p802_p5)
}
 0x104   : > { %s806_s24 = scalar_lea.hbm %s1033_s17, %s1024_s6  ;;  %s810_s27 = scalar_lea.hbm %s1081_s2, 384 }
 0x105   : > { %p807_p7 = scmp.ne.s32.totalorder %s1033_s17, %s806_s24  ;;  %p811_p10 = scmp.lt.s32.totalorder %s1033_s17, %s1081_s2 }
 0x106   : > { %p812_p11 = scmp.lt.s32.totalorder %s810_s27, %s806_s24 }
 0x107   : > { %p808_p8 = pnand %p807_p7, %p721_p12 }
 0x108   : > { %p813_p13 = por %p812_p11, %p811_p10 }
 0x109   : > { %p809_p9 = pneg %p808_p8 }
 0x10b   : > { %p814_p0 = pnand %p813_p13, %p809_p9 }
 0x10d   : > { %817 = shalt.err (!%p814_p0)
}
 0x10e   : > { %s862_s30 = smov 128   ;;  %s863_s3 = smov 8  }
 0x10f   : > { %638 = dma.vmem_to_hbm [thread:$0]  (%p721_p12), %s1036_s19, %s1024_s6, %s1033_s17, %s1019_s4, %s862_s30, %s862_s30, %s863_s3  }
 0x110 PF: > { %p741_p1 = scmp.ge.s32.totalorder %s852_s12, 2  ;;  %s647_s5 = sand.u32 1, %s840_s9  }
 0x111   : > { %s648_s7 = scalar_lea.sflag [#allocation3], %s647_s5 }
 0x112   : > { %p738_p2 = pnand %p741_p1, %p921_p6 }
 0x114   : > { %p739_p3 = pneg %p738_p2 }
 0x116   : > { %835 = dma.done.wait (%p739_p3), %s648_s7, 256  }
 0x117   : > { %837 = vsyncadd (%p739_p3), %s648_s7, 4294967040  ;;  %p12_p4 = scmp.ge.s32.totalorder %s904_s15, 4   ;;  %s1086_s9 = smov %s844_s10 }
 0x118   : > { %s1087_s10 = smov %s848_s11  ;;  %s1088_s11 = smov %s915_s18 }
 0x119   : > { %s1089_s12 = smov %s904_s15  ;;  %14 = sbr.rel (!%p12_p4) target bundleno = 3 (0x3), region = 63 }
 0x11e   :  { %653 = vsyncpa [#allocation3], 1 }
 0x11f   :  { %655 = vsyncpa [#allocation3 + $0x1], 1 }

</bundles_post_ra>
